<compile_context>
chip_gen: v7x
topology: tpu7x:2x2x1
jax: 0.10.0
libtpu: 0.0.40
codegen_flags: <defaults>
</compile_context>

<pallas_src>
import jax
import jax.numpy as jnp
from jax.experimental import pallas as pl
from jax.experimental.pallas import tpu as pltpu


def _round_up(n, m):
    return ((n + m - 1) // m) * m


def _cdiv(n, m):
    return (n + m - 1) // m


def _mlp_kernel(*refs):
    """Fused MLP kernel for one batch tile.

    refs = (x_ref, w0, b0, w1, b1, ..., w_{L-1}, b_{L-1}, out_ref)
    Linear -> ReLU for every layer except the last (identity), matching
    QNetwork.forward. Layers with contraction dim < 8 use VPU broadcast-FMAs
    in f32 (skips a nearly-empty MXU pass); larger layers use the MXU with
    bf16 operands and f32 accumulation.
    """
    x_ref, out_ref = refs[0], refs[-1]
    param_refs = refs[1:-1]
    n_layers = len(param_refs) // 2

    x = x_ref[...]                                   # f32 (tile_b, in_dim)
    for i in range(n_layers):
        w = param_refs[2 * i][...]                   # (in_i, out_i)
        b = param_refs[2 * i + 1][...]               # (1, out_i) f32
        k = w.shape[0]
        if k < 8:
            # Tiny contraction (first layer, K=4): VPU broadcast-FMA path.
            w = w.astype(jnp.float32)
            acc = jnp.broadcast_to(b, (x.shape[0], w.shape[1]))
            for kk in range(k):
                acc = acc + x[:, kk:kk + 1] * w[kk:kk + 1, :]
            x = acc
        else:
            x = jnp.dot(x.astype(w.dtype), w,
                        preferred_element_type=jnp.float32) + b
        if i < n_layers - 1:
            x = jnp.maximum(x, 0.0)                  # F.relu on hidden layers only
    out_ref[...] = x.astype(out_ref.dtype)


def prepare_params(weights, biases, *, use_bf16=True):
    """One-time parameter prep (keep this OUT of the per-call hot path).

    weights: list of (in_i, out_i) f32 arrays (already transposed vs torch's (out, in))
    biases:  list of (out_i,) f32 arrays
    Returns (weights', biases') where
      * the last layer's out dim is zero-padded to a multiple of 128 (lane-dense store),
      * layers with in_i >= 8 are cast to bf16 (MXU-native; kernel accumulates in f32),
      * biases are reshaped to (1, out_i) and kept f32.
    """
    weights = [jnp.asarray(w, jnp.float32) for w in weights]
    biases = [jnp.asarray(b, jnp.float32).reshape(1, -1) for b in biases]

    out_dim = weights[-1].shape[1]
    out_dim_p = _round_up(out_dim, 128)
    if out_dim_p != out_dim:
        pad_c = out_dim_p - out_dim
        weights[-1] = jnp.pad(weights[-1], ((0, 0), (0, pad_c)))
        biases[-1] = jnp.pad(biases[-1], ((0, 0), (0, pad_c)))

    if use_bf16:
        weights = [w.astype(jnp.bfloat16) if w.shape[0] >= 8 else w for w in weights]
    return tuple(weights), tuple(biases)


def qnetwork_forward(x, weights, biases, *, out_dim=None, max_tile_b=1024):
    """Fused QNetwork forward pass (weights/biases must come from prepare_params).

    x: (batch, in_dim) f32.
    If out_dim is given the result is sliced back to (batch, out_dim).
    If out_dim is None the padded (batch_pad, out_dim_padded) slab is returned
    (no extra slice kernel per call); valid data lives in [:batch, :true_out_dim].
    """
    batch, in_dim = x.shape
    out_dim_p = weights[-1].shape[1]

    # Batch-aware tiling: minimal sublane padding; grid length is even whenever
    # batch > 8 so the "parallel" axis can shard across both v7x TensorCores.
    batch_p = _round_up(batch, 8)
    if batch_p <= 8:
        n_steps = 1
    else:
        n_steps = 2 * max(1, _cdiv(batch_p, 2 * max_tile_b))
    tile_b = _round_up(_cdiv(batch_p, n_steps), 8)
    batch_pad = tile_b * n_steps
    if batch_pad != batch:
        x = jnp.pad(x, ((0, batch_pad - batch), (0, 0)))

    # Activations tile over the batch; parameters use constant index_maps so
    # they stay VMEM-resident across grid steps.
    operands = [x]
    in_specs = [pl.BlockSpec((tile_b, in_dim), lambda i: (i, 0))]
    for w, b in zip(weights, biases):
        operands += [w, b]
        in_specs += [pl.BlockSpec(w.shape, lambda i: (0, 0)),
                     pl.BlockSpec(b.shape, lambda i: (0, 0))]

    # Size the scoped-VMEM request from the actual buffers (double-buffered
    # activation/output tiles + resident params + kernel temporaries), with
    # generous headroom, instead of a blanket 32 MiB.
    max_width = max([in_dim] + [w.shape[1] for w in weights])
    param_bytes = sum(int(a.size) * a.dtype.itemsize for a in (*weights, *biases))
    io_bytes = 2 * tile_b * (in_dim + out_dim_p) * 4        # 2x: double buffering
    act_bytes = 4 * tile_b * max_width * 4                  # in-kernel intermediates
    vmem_limit = int(min(64 << 20, max(8 << 20, 4 * (param_bytes + io_bytes + act_bytes))))

    out = pl.pallas_call(
        _mlp_kernel,
        out_shape=jax.ShapeDtypeStruct((batch_pad, out_dim_p), jnp.float32),
        grid=(n_steps,),
        in_specs=in_specs,
        out_specs=pl.BlockSpec((tile_b, out_dim_p), lambda i: (i, 0)),
        compiler_params=pltpu.CompilerParams(
            dimension_semantics=("parallel",),   # batch tiles are independent
            vmem_limit_bytes=vmem_limit,
        ),
    )(*operands)

    if out_dim is None:
        return out                      # padded slab; no extra slice kernel
    return out[:batch, :out_dim]


def init_params(architecture, key):
    """Deterministic init mimicking torch.nn.Linear (uniform +/- 1/sqrt(fan_in)).

    Weights are returned in (in_features, out_features) layout (transposed vs
    torch's (out, in) storage); biases have shape (out_features,).
    """
    weights, biases = [], []
    for i in range(len(architecture) - 1):
        fan_in, fan_out = architecture[i], architecture[i + 1]
        key, kw, kb = jax.random.split(key, 3)
        bound = 1.0 / jnp.sqrt(jnp.float32(fan_in))
        weights.append(jax.random.uniform(kw, (fan_in, fan_out), jnp.float32, -bound, bound))
        biases.append(jax.random.uniform(kb, (fan_out,), jnp.float32, -bound, bound))
    return weights, biases


def reference_forward(x, weights, biases):
    """Pure-JAX f32 reference of QNetwork.forward (original, unprepared params)."""
    for i, (w, b) in enumerate(zip(weights, biases)):
        x = x @ w + b
        if i < len(weights) - 1:
            x = jnp.maximum(x, 0.0)
    return x


def reference_forward_prepared(x, weights, biases, out_dim):
    """Reference mirroring the kernel's exact dtype handling (bf16 MXU layers,
    f32 accumulation) for a tight numeric comparison."""
    x = x.astype(jnp.float32)
    for i, (w, b) in enumerate(zip(weights, biases)):
        if w.shape[0] < 8:
            x = x @ w.astype(jnp.float32) + b
        else:
            x = jnp.dot(x.astype(w.dtype), w, preferred_element_type=jnp.float32) + b
        if i < len(weights) - 1:
            x = jnp.maximum(x, 0.0)
    return x[:, :out_dim]


if __name__ == "__main__":
    # CartPole-like architecture: 4 state dims -> 64 -> 64 -> 2 action values.
    architecture = [4, 64, 64, 2]
    out_dim = architecture[-1]

    key = jax.random.PRNGKey(0)
    weights, biases = init_params(architecture, key)
    pw, pb = prepare_params(weights, biases)       # one-time prep, outside hot path

    # Tiny inference-style batch (batch=2 -> single 8-row tile, grid=(1,)).
    key, kx = jax.random.split(key)
    x_small = jax.random.normal(kx, (2, architecture[0]), dtype=jnp.float32)
    out_small = jax.block_until_ready(qnetwork_forward(x_small, pw, pb, out_dim=out_dim))
    assert out_small.shape == (2, out_dim)
    ref_small_exact = reference_forward_prepared(x_small, pw, pb, out_dim)
    ref_small_f32 = reference_forward(x_small, weights, biases)
    assert jnp.allclose(out_small, ref_small_exact, atol=1e-4, rtol=1e-4), "small: vs exact ref"
    assert jnp.allclose(out_small, ref_small_f32, atol=5e-2, rtol=5e-2), "small: vs f32 ref"

    # DQN-training-style batch (300 -> 2 x 152-row tiles; exercises the
    # multi-step "parallel" grid and the 4-row ragged-batch pad).
    key, kx2 = jax.random.split(key)
    x_big = jax.random.normal(kx2, (300, architecture[0]), dtype=jnp.float32)
    out_big = jax.block_until_ready(qnetwork_forward(x_big, pw, pb, out_dim=out_dim))
    assert out_big.shape == (300, out_dim)
    ref_big_exact = reference_forward_prepared(x_big, pw, pb, out_dim)
    ref_big_f32 = reference_forward(x_big, weights, biases)
    assert jnp.allclose(out_big, ref_big_exact, atol=1e-4, rtol=1e-4), "big: vs exact ref"
    assert jnp.allclose(out_big, ref_big_f32, atol=5e-2, rtol=5e-2), "big: vs f32 ref"

    # Padded-slab path (no trailing slice kernel); valid data in [:batch, :out_dim].
    out_padded = jax.block_until_ready(qnetwork_forward(x_big, pw, pb))
    assert out_padded.shape[1] % 128 == 0
    assert jnp.allclose(out_padded[:300, :out_dim], out_big, atol=1e-6)

    print("KERNEL_OK")
</pallas_src>

<mosaic_0001>
module attributes {stable_mosaic.version = 11 : i64} {
  func.func @_mlp_kernel(%arg0: i32, %arg1: memref<8x4xf32, #tpu.memory_space<vmem>>, %arg2: memref<4x64xf32, #tpu.memory_space<vmem>>, %arg3: memref<1x64xf32, #tpu.memory_space<vmem>>, %arg4: memref<64x64xbf16, #tpu.memory_space<vmem>>, %arg5: memref<1x64xf32, #tpu.memory_space<vmem>>, %arg6: memref<64x128xbf16, #tpu.memory_space<vmem>>, %arg7: memref<1x128xf32, #tpu.memory_space<vmem>>, %arg8: memref<8x128xf32, #tpu.memory_space<vmem>>) attributes {dimension_semantics = [#tpu.dimension_semantics<parallel>], iteration_bounds = array<i64: 1>, scalar_prefetch = 0 : i64, scratch_operands = 0 : i64, tpu.core_type = #tpu.core_type<tc>, window_params = [{transform_indices = @transform_0, window_bounds = array<i64: 8, 4>}, {pipeline_mode = #tpu.pipeline_mode<synchronous>, transform_indices = @transform_1, window_bounds = array<i64: 4, 64>}, {pipeline_mode = #tpu.pipeline_mode<synchronous>, transform_indices = @transform_2, window_bounds = array<i64: 1, 64>}, {pipeline_mode = #tpu.pipeline_mode<synchronous>, transform_indices = @transform_3, window_bounds = array<i64: 64, 64>}, {pipeline_mode = #tpu.pipeline_mode<synchronous>, transform_indices = @transform_4, window_bounds = array<i64: 1, 64>}, {pipeline_mode = #tpu.pipeline_mode<synchronous>, transform_indices = @transform_5, window_bounds = array<i64: 64, 128>}, {pipeline_mode = #tpu.pipeline_mode<synchronous>, transform_indices = @transform_6, window_bounds = array<i64: 1, 128>}, {transform_indices = @transform_7, window_bounds = array<i64: 8, 128>}]} {
    %c0 = arith.constant 0 : index
    %c0_0 = arith.constant 0 : index
    %0 = vector.load %arg1[%c0, %c0_0] : memref<8x4xf32, #tpu.memory_space<vmem>>, vector<8x4xf32>
    %c0_1 = arith.constant 0 : index
    %c0_2 = arith.constant 0 : index
    %1 = vector.load %arg2[%c0_1, %c0_2] : memref<4x64xf32, #tpu.memory_space<vmem>>, vector<4x64xf32>
    %c0_3 = arith.constant 0 : index
    %c0_4 = arith.constant 0 : index
    %2 = vector.load %arg3[%c0_3, %c0_4] : memref<1x64xf32, #tpu.memory_space<vmem>>, vector<1x64xf32>
    %3 = vector.shape_cast %2 : vector<1x64xf32> to vector<1x64xf32>
    %4 = vector.broadcast %3 : vector<1x64xf32> to vector<8x64xf32>
    %5 = vector.extract_strided_slice %0 {offsets = [0, 0], sizes = [8, 1], strides = [1, 1]} : vector<8x4xf32> to vector<8x1xf32>
    %6 = vector.extract_strided_slice %1 {offsets = [0, 0], sizes = [1, 64], strides = [1, 1]} : vector<4x64xf32> to vector<1x64xf32>
    %7 = vector.broadcast %5 : vector<8x1xf32> to vector<8x64xf32>
    %8 = vector.broadcast %6 : vector<1x64xf32> to vector<8x64xf32>
    %9 = arith.mulf %7, %8 : vector<8x64xf32>
    %10 = arith.addf %4, %9 : vector<8x64xf32>
    %11 = vector.extract_strided_slice %0 {offsets = [0, 1], sizes = [8, 1], strides = [1, 1]} : vector<8x4xf32> to vector<8x1xf32>
    %12 = vector.extract_strided_slice %1 {offsets = [1, 0], sizes = [1, 64], strides = [1, 1]} : vector<4x64xf32> to vector<1x64xf32>
    %13 = vector.broadcast %11 : vector<8x1xf32> to vector<8x64xf32>
    %14 = vector.broadcast %12 : vector<1x64xf32> to vector<8x64xf32>
    %15 = arith.mulf %13, %14 : vector<8x64xf32>
    %16 = arith.addf %10, %15 : vector<8x64xf32>
    %17 = vector.extract_strided_slice %0 {offsets = [0, 2], sizes = [8, 1], strides = [1, 1]} : vector<8x4xf32> to vector<8x1xf32>
    %18 = vector.extract_strided_slice %1 {offsets = [2, 0], sizes = [1, 64], strides = [1, 1]} : vector<4x64xf32> to vector<1x64xf32>
    %19 = vector.broadcast %17 : vector<8x1xf32> to vector<8x64xf32>
    %20 = vector.broadcast %18 : vector<1x64xf32> to vector<8x64xf32>
    %21 = arith.mulf %19, %20 : vector<8x64xf32>
    %22 = arith.addf %16, %21 : vector<8x64xf32>
    %23 = vector.extract_strided_slice %0 {offsets = [0, 3], sizes = [8, 1], strides = [1, 1]} : vector<8x4xf32> to vector<8x1xf32>
    %24 = vector.extract_strided_slice %1 {offsets = [3, 0], sizes = [1, 64], strides = [1, 1]} : vector<4x64xf32> to vector<1x64xf32>
    %25 = vector.broadcast %23 : vector<8x1xf32> to vector<8x64xf32>
    %26 = vector.broadcast %24 : vector<1x64xf32> to vector<8x64xf32>
    %27 = arith.mulf %25, %26 : vector<8x64xf32>
    %28 = arith.addf %22, %27 : vector<8x64xf32>
    %cst = arith.constant 0.000000e+00 : f32
    %29 = vector.broadcast %cst : f32 to vector<8x64xf32>
    %30 = arith.maximumf %28, %29 : vector<8x64xf32>
    %c0_5 = arith.constant 0 : index
    %c0_6 = arith.constant 0 : index
    %31 = vector.load %arg4[%c0_5, %c0_6] : memref<64x64xbf16, #tpu.memory_space<vmem>>, vector<64x64xbf16>
    %c0_7 = arith.constant 0 : index
    %c0_8 = arith.constant 0 : index
    %32 = vector.load %arg5[%c0_7, %c0_8] : memref<1x64xf32, #tpu.memory_space<vmem>>, vector<1x64xf32>
    %33 = arith.truncf %30 : vector<8x64xf32> to vector<8x64xbf16>
    %cst_9 = arith.constant dense<0.000000e+00> : vector<8x64xf32>
    %34 = tpu.matmul %33, %31, %cst_9 {dimension_numbers = #tpu.dot_dimension_numbers<[1], [0], [0], [1], [0, 0, 1, 1], [], []>} : vector<8x64xbf16>, vector<64x64xbf16>, vector<8x64xf32> -> vector<8x64xf32>
    %35 = vector.broadcast %32 : vector<1x64xf32> to vector<8x64xf32>
    %36 = arith.addf %34, %35 : vector<8x64xf32>
    %cst_10 = arith.constant 0.000000e+00 : f32
    %37 = vector.broadcast %cst_10 : f32 to vector<8x64xf32>
    %38 = arith.maximumf %36, %37 : vector<8x64xf32>
    %c0_11 = arith.constant 0 : index
    %c0_12 = arith.constant 0 : index
    %39 = vector.load %arg6[%c0_11, %c0_12] : memref<64x128xbf16, #tpu.memory_space<vmem>>, vector<64x128xbf16>
    %c0_13 = arith.constant 0 : index
    %c0_14 = arith.constant 0 : index
    %40 = vector.load %arg7[%c0_13, %c0_14] : memref<1x128xf32, #tpu.memory_space<vmem>>, vector<1x128xf32>
    %41 = arith.truncf %38 : vector<8x64xf32> to vector<8x64xbf16>
    %cst_15 = arith.constant dense<0.000000e+00> : vector<8x128xf32>
    %42 = tpu.matmul %41, %39, %cst_15 {dimension_numbers = #tpu.dot_dimension_numbers<[1], [0], [0], [1], [0, 0, 1, 1], [], []>} : vector<8x64xbf16>, vector<64x128xbf16>, vector<8x128xf32> -> vector<8x128xf32>
    %43 = vector.broadcast %40 : vector<1x128xf32> to vector<8x128xf32>
    %44 = arith.addf %42, %43 : vector<8x128xf32>
    %c0_16 = arith.constant 0 : index
    %c0_17 = arith.constant 0 : index
    %45 = vector.load %arg8[%c0_16, %c0_17] : memref<8x128xf32, #tpu.memory_space<vmem>>, vector<8x128xf32>
    tpu.vector_store %arg8[%c0_16, %c0_17], %44 {strides = array<i32>} : memref<8x128xf32, #tpu.memory_space<vmem>>, vector<8x128xf32>,
    return
  }
  func.func @transform_0(%arg0: i32) -> (i32, i32) {
    %c0_i32 = arith.constant 0 : i32
    %c0_i32_0 = arith.constant 0 : i32
    return %arg0, %c0_i32 : i32, i32
  }
  func.func @transform_1(%arg0: i32) -> (i32, i32) {
    %c0_i32 = arith.constant 0 : i32
    %c0_i32_0 = arith.constant 0 : i32
    %c0_i32_1 = arith.constant 0 : i32
    return %c0_i32, %c0_i32_0 : i32, i32
  }
  func.func @transform_2(%arg0: i32) -> (i32, i32) {
    %c0_i32 = arith.constant 0 : i32
    %c0_i32_0 = arith.constant 0 : i32
    %c0_i32_1 = arith.constant 0 : i32
    return %c0_i32, %c0_i32_0 : i32, i32
  }
  func.func @transform_3(%arg0: i32) -> (i32, i32) {
    %c0_i32 = arith.constant 0 : i32
    %c0_i32_0 = arith.constant 0 : i32
    %c0_i32_1 = arith.constant 0 : i32
    return %c0_i32, %c0_i32_0 : i32, i32
  }
  func.func @transform_4(%arg0: i32) -> (i32, i32) {
    %c0_i32 = arith.constant 0 : i32
    %c0_i32_0 = arith.constant 0 : i32
    %c0_i32_1 = arith.constant 0 : i32
    return %c0_i32, %c0_i32_0 : i32, i32
  }
  func.func @transform_5(%arg0: i32) -> (i32, i32) {
    %c0_i32 = arith.constant 0 : i32
    %c0_i32_0 = arith.constant 0 : i32
    %c0_i32_1 = arith.constant 0 : i32
    return %c0_i32, %c0_i32_0 : i32, i32
  }
  func.func @transform_6(%arg0: i32) -> (i32, i32) {
    %c0_i32 = arith.constant 0 : i32
    %c0_i32_0 = arith.constant 0 : i32
    %c0_i32_1 = arith.constant 0 : i32
    return %c0_i32, %c0_i32_0 : i32, i32
  }
  func.func @transform_7(%arg0: i32) -> (i32, i32) {
    %c0_i32 = arith.constant 0 : i32
    %c0_i32_0 = arith.constant 0 : i32
    return %arg0, %c0_i32 : i32, i32
  }
}

</mosaic_0001>

<bundles_post_ra>
// kernel: tpu_custom_call.1
= control target key start
LH: loop header
LB: loop body
LE: loop exit
PB: predicated region body
PF: predicated region fallthrough
CT: control target
= control target key end

     0   :  { %12 = vsyncpa [#allocation3], 0  ;;  %s539_s0 = inlined_call_operand.vmem [shape: f32[8,4], index: 0, kind: input, shape index: {}]   ;;  %s540_s1 = inlined_call_operand.vmem [shape: f32[4,64], index: 1, kind: input, shape index: {}]   ;;  %s541_s2 = inlined_call_operand.vmem [shape: f32[1,64], index: 2, kind: input, shape index: {}]   ;;  %s542_s3 = inlined_call_operand.hbm [shape: bf16[64,64], index: 3, kind: input, shape index: {}]   ;;  %s543_s4 = inlined_call_operand.vmem [shape: f32[1,64], index: 4, kind: input, shape index: {}]   ;;  %s544_s5 = inlined_call_operand.hbm [shape: bf16[64,128], index: 5, kind: input, shape index: {}]   ;;  %s545_s6 = inlined_call_operand.vmem [shape: f32[1,128], index: 6, kind: input, shape index: {}]   ;;  %s546_s7 = inlined_call_operand.hbm [shape: f32[8,128], index: 7, kind: output, shape index: {}]  }
   0x1   :  { %13 = vsyncpa [#allocation6], 0 }
   0x2   :  { %14 = vsyncpa [#allocation4], 0  ;;  %s435_s24 = smov [#allocation2]   ;;  %s363_s28 = scalar_lea.hbm %s542_s3, 512 }
   0x3   :  { %s26_s25 = sshll.u32 %s435_s24, 4  ;;  %p364_p0 = scmp.ne.s32.totalorder %s542_s3, %s363_s28  ;;  %s27_s25 = int_to_ptr.vmem [resolvable:$true] %s26_s25 }
   0x4   :  { %p367_p1 = scmp.lt.u32.totalorder %s363_s28, %s542_s3 }
   0x6   :  { %p369_p2 = pnand %p367_p1, %p364_p0 }
   0x8   :  { %372 = shalt.err (!%p369_p2)
}
   0x9   :  { %s373_s10 = scalar_lea.vmem %s27_s25, 512  ;;  %p378_p4 = scmp.lt.s32.totalorder %s27_s25, %s27_s25 }
   0xa   :  { %p374_p3 = scmp.ne.s32.totalorder %s27_s25, %s373_s10  ;;  %p379_p5 = scmp.lt.s32.totalorder %s373_s10, %s373_s10 }
   0xc   :  { %p380_p6 = por %p379_p5, %p378_p4 }
   0xe   :  { %p381_p7 = pnand %p380_p6, %p374_p3 }
  0x10   :  { %384 = shalt.err (!%p381_p7)
}
  0x11   :  { %s436_s11 = smov 64   ;;  %s437_s12 = smov 4  }
  0x12   :  { %32 = dma.hbm_to_vmem [thread:$0]  %s542_s3, 512, %s27_s25, [#allocation3], %s436_s11, %s436_s11, %s437_s12  }
  0x13   :  { %s438_s15 = smov [#allocation5]   ;;  %s385_s19 = scalar_lea.hbm %s544_s5, 512 }
  0x14   :  { %s40_s16 = sshll.u32 %s438_s15, 4  ;;  %p386_p8 = scmp.ne.s32.totalorder %s544_s5, %s385_s19  ;;  %s41_s16 = int_to_ptr.vmem [resolvable:$true] %s40_s16 }
  0x15   :  { %p389_p9 = scmp.lt.u32.totalorder %s385_s19, %s544_s5 }
  0x17   :  { %p391_p10 = pnand %p389_p9, %p386_p8 }
  0x19   :  { %394 = shalt.err (!%p391_p10)
}
  0x1a   :  { %s395_s24 = scalar_lea.vmem %s41_s16, 512  ;;  %p400_p12 = scmp.lt.s32.totalorder %s41_s16, %s41_s16 }
  0x1b   :  { %p396_p11 = scmp.ne.s32.totalorder %s41_s16, %s395_s24  ;;  %p401_p13 = scmp.lt.s32.totalorder %s395_s24, %s395_s24 }
  0x1d   :  { %p402_p0 = por %p401_p13, %p400_p12 }
  0x1f   :  { %p403_p1 = pnand %p402_p0, %p396_p11 }
  0x21   :  { %406 = shalt.err (!%p403_p1)
}
  0x22   :  { %46 = dma.hbm_to_vmem [thread:$0]  %s544_s5, 512, %s41_s16, [#allocation6], %s436_s11, %s436_s11, %s437_s12  }
  0x23   :  { %429 = dma.done.wait [#allocation3], 512  }
  0x24   :  { %430 = vsyncadd [#allocation3], 4294966784 }
  0x25   :  { %431 = dma.done.wait [#allocation6], 512  }
  0x26   :  { %432 = vsyncadd [#allocation6], 4294966784  ;;  %v439_v0 = vmov 0   ;;  %v440_v1 = vmov 2   ;;  %v56_v2 = vld [vmem:[%s539_s0] sm:$0xff]  ;;  %v441_v4 = vmov 0.0   ;;  %v70_v12 = vlaneseq }
  0x27   :  { %350 = vset.pattern.permute.xlu0 %v439_v0  ;;  %352 = vset.pattern.permute.xlu1 %v440_v1  ;;  %v355_v3 = vld [vmem:[#allocation2] sm:$0xff]   ;;  %v442_v5 = vmov 1   ;;  %v443_v6 = vmov 3   ;;  %v356_v7 = vld [vmem:[#allocation2 + $0x8] sm:$0xff]   ;;  %v357_v8 = vld [vmem:[#allocation2 + $0x10] sm:$0xff]   ;;  %vm444_vm0 = vmmov 0  }
  0x28   :  { %67 = vperm.xlu0 %350, %v56_v2   ;;  %87 = vperm.xlu1 %352, %v56_v2   ;;  %v358_v9 = vld [vmem:[#allocation2 + $0x18] sm:$0xff]   ;;  %v359_v10 = vld [vmem:[#allocation5] sm:$0xff]   ;;  %v360_v11 = vld [vmem:[#allocation5 + $0x8] sm:$0xff]   ;;  %v71_v13 = vshrl.u32 %v70_v12, 7  ;;  %vm147_vm1 = vcmask 523264   ;;  %s445_s9 = smov [#allocation7]  }
  0x29   :  { %315 = vmatprep.subr.bf16.mxu0 %v441_v4  ;;  %327 = vmatprep.subr.bf16.mxu1 %v441_v4  ;;  %v57_v15 = vld [vmem:[%s540_s1] sm:$0xf]  ;;  %v361_v38 = vld [vmem:[#allocation5 + $0x10] sm:$0xff]   ;;  %v362_v39 = vld [vmem:[#allocation5 + $0x18] sm:$0xff]   ;;  %s282_s10 = sshll.u32 %s445_s9, 4  ;;  %s283_s10 = int_to_ptr.vmem [resolvable:$true] %s282_s10 }
  0x2a   :  { %316 = vmatpush3.bf16.msra.mxu0 %v355_v3  ;;  %323 = vmatprep.mubr.msk.bf16.mxu0 %vm444_vm0, %v441_v4  ;;  %v72_v14 = vsub.s32 0, %v71_v13  ;;  %v82_v17 = vsub.s32 1, %v71_v13  ;;  %v92_v19 = vsub.s32 2, %v71_v13  ;;  %v102_v21 = vsub.s32 3, %v71_v13  ;;  %v292_v24 = vld [vmem:[%s541_s2] ss:$0 sm:$0xff]  ;;  %p412_p3 = scmp.lt.s32.totalorder %s283_s10, %s283_s10 }
  0x2b   :  { %317 = vmatprep.subr.bf16.mxu0 %v441_v4  ;;  %335 = vmatprep.mubr.msk.bf16.mxu1 %vm444_vm0, %v441_v4  ;;  %v293_v40 = vld [vmem:[%s543_s4] ss:$0 sm:$0xff]  ;;  %s407_s4 = scalar_lea.vmem %s283_s10, 128 }
  0x2c   :  { %351 = vset.pattern.permute.xlu0 %v442_v5  ;;  %353 = vset.pattern.permute.xlu1 %v443_v6  ;;  %v73_v16 = vrot.slane %v57_v15, %v72_v14  ;;  %v83_v23 = vrot.slane %v57_v15, %v82_v17  ;;  %v93_v25 = vrot.slane %v57_v15, %v92_v19  ;;  %v299_v48 = vld [vmem:[%s545_s6] ss:$0 sm:$0xff]  ;;  %p408_p2 = scmp.ne.s32.totalorder %s283_s10, %s407_s4  ;;  %p413_p4 = scmp.lt.s32.totalorder %s407_s4, %s407_s4 }
  0x2d   :  { %77 = vperm.xlu0 %351, %v56_v2   ;;  %97 = vperm.xlu1 %353, %v56_v2   ;;  %v103_v26 = vrot.slane %v57_v15, %v102_v21 }
  0x2e   :  { %318 = vmatpush3.bf16.msra.mxu0 %v356_v7  ;;  %328 = vmatpush3.bf16.msra.mxu1 %v359_v10  ;;  %p414_p5 = por %p413_p4, %p412_p3 }
  0x2f   :  { %319 = vmatprep.subr.bf16.mxu0 %v441_v4  ;;  %329 = vmatprep.subr.bf16.mxu1 %v441_v4 }
  0x30   :  { %p415_p6 = pnand %p414_p5, %p408_p2 }
  0x31   :  { %354 = vset.pattern.permute.xlu0 %v443_v6 }
  0x32   :  { %320 = vmatpush3.bf16.msra.mxu0 %v357_v8  ;;  %330 = vmatpush3.bf16.msra.mxu1 %v360_v11 }
  0x33   :  { %321 = vmatprep.subr.bf16.mxu0 %v441_v4  ;;  %331 = vmatprep.subr.bf16.mxu1 %v441_v4 }
  0x36   :  { %322 = vmatpush3.bf16.msra.mxu0 %v358_v9  ;;  %332 = vmatpush3.bf16.msra.mxu1 %v361_v38 }
  0x37   :  { %333 = vmatprep.subr.bf16.mxu1 %v441_v4 }
  0x3a   :  { %334 = vmatpush3.bf16.msra.mxu1 %v362_v39 }
  0xa7   :  { %v68_v18 = vpop.permute.xlu0 %67  ;;  %v88_v20 = vpop.permute.xlu1 %87 }
  0xa8   :  { %v74_v22 = vmul.f32 %v73_v16, %v68_v18  ;;  %v94_v31 = vmul.f32 %v93_v25, %v88_v20 }
  0xaa   :  { %v75_v29 = vadd.f32 %v292_v24, %v74_v22 }
  0xac   :  { %v78_v27 = vpop.permute.xlu0 %77  ;;  %v98_v28 = vpop.permute.xlu1 %97 }
  0xad   :  { %v84_v30 = vmul.f32 %v83_v23, %v78_v27  ;;  %v104_v33 = vmul.f32 %v103_v26, %v98_v28 }
  0xaf   :  { %v85_v32 = vadd.f32 %v84_v30, %v75_v29 }
  0xb1   :  { %v95_v34 = vadd.f32 %v94_v31, %v85_v32 }
  0xb3   :  { %v105_v35 = vadd.f32 %v104_v33, %v95_v34 }
  0xb5   :  { %v106_v36 = vmax.f32 %v105_v35, 0.0 }
  0xb7   :  { %v116_v37 = vpack.c.bf16 %v106_v36, %v106_v36 }
  0xb9   :  { %324 = vmatmul.mubr.msk.bf16.vlgmr.msra.gmra.mrb[0].mxu0 %vm147_vm1, %v116_v37 }
 0x18c   :  { %v185_v41 = vpop.f32.mrb[0].mxu0 }
 0x18d   :  { %v186_v42 = vadd.f32 %v293_v40, %v185_v41  ;;  %v325_v43 = vpop.f32.mrb[1].mxu0 }
 0x18e   :  { %v188_v44 = vpop.f32.mrb[2].mxu0 }
 0x18f   :  { %v191_v45 = vmax.f32 %v186_v42, 0.0  ;;  %v326_v46 = vpop.f32.mrb[3].mxu0 }
 0x191   :  { %v201_v47 = vpack.c.bf16 %v191_v45, %v191_v45 }
 0x193   :  { %336 = vmatmul.mubr.msk.bf16.vlgmr.msra.gmra.mrb[0].mxu1 %vm147_vm1, %v201_v47 }
 0x266   :  { %v269_v49 = vpop.f32.mrb[0].mxu1 }
 0x267   :  { %v270_v50 = vadd.f32 %v299_v48, %v269_v49  ;;  %v337_v51 = vpop.f32.mrb[1].mxu1 }
 0x268   :  { %v272_v52 = vpop.f32.mrb[2].mxu1 }
 0x269   :  { %275 = vst [vmem:[#allocation7] sm:$0xff] %v270_v50  ;;  %v338_v53 = vpop.f32.mrb[3].mxu1 }
 0x26a   :  { %418 = shalt.err (!%p415_p6)
}
 0x26b   :  { %s419_s6 = scalar_lea.hbm %s546_s7, 128 }
 0x26c   :  { %p420_p7 = scmp.ne.s32.totalorder %s546_s7, %s419_s6  ;;  %p423_p8 = scmp.lt.u32.totalorder %s419_s6, %s546_s7 }
 0x26e   :  { %p425_p9 = pnand %p423_p8, %p420_p7 }
 0x270   :  { %428 = shalt.err (!%p425_p9)
}
 0x271   :  { %285 = dma.vmem_to_hbm [thread:$0]  %s283_s10, 128, %s546_s7, [#allocation4]  }
 0x272   :  { %433 = dma.done.wait [#allocation4], 128  }
 0x273   :  { %434 = vsyncadd [#allocation4], 4294967168 }
 0x274   :  { %289 = vsyncpa [#allocation3], 1 }
 0x275   :  { %290 = vsyncpa [#allocation6], 1 }
 0x276   :  { %291 = vsyncpa [#allocation4], 1 }

</bundles_post_ra>
